<compile_context>
chip_gen: v7x
topology: tpu7x:2x2x1
jax: 0.10.0
libtpu: 0.0.40
codegen_flags: <defaults>
</compile_context>

<pallas_src>
import functools

import jax
import jax.numpy as jnp
from jax.experimental import pallas as pl
from jax.experimental.pallas import tpu as pltpu


# ----------------------------------------------------------------------------
# Kernels
# ----------------------------------------------------------------------------

def pinn_kernel_reg(x_ref, w_in_ref, b_in_ref, w_hid_ref, b_hid_ref,
                    w_out_ref, b_out_ref, o_ref,
                    *, n_hidden_layers, input_dim, chunk):
    """Register-resident activations; batch tile processed in lane sub-chunks."""
    bt = x_ref.shape[1]
    n_chunks = bt // chunk

    w_in = w_in_ref[...]                 # (hidden, input_dim)
    b_in = b_in_ref[...]                 # (hidden, 1)
    w_out = w_out_ref[...]               # (output_dim, hidden)
    b_out = b_out_ref[...]               # (output_dim, 1)

    for c in range(n_chunks):
        x = x_ref[:, c * chunk:(c + 1) * chunk]        # (input_dim, chunk)

        # Input layer: K = input_dim is tiny for a PINN -> VPU broadcast FMAs.
        if input_dim <= 8:
            h = w_in[:, 0:1] * x[0:1, :]               # (hidden, chunk)
            for k in range(1, input_dim):
                h = h + w_in[:, k:k + 1] * x[k:k + 1, :]
        else:
            h = jnp.dot(w_in, x, preferred_element_type=jnp.float32)
        h = jnp.tanh(h + b_in)

        # Hidden layers: h stays in vregs across the whole stack.
        for n in range(n_hidden_layers):
            z = jnp.dot(w_hid_ref[n], h,
                        preferred_element_type=jnp.float32) + b_hid_ref[n]
            h = jnp.tanh(z)

        # Output layer (no activation). Lane-dense store.
        out = jnp.dot(w_out, h, preferred_element_type=jnp.float32) + b_out
        o_ref[:, c * chunk:(c + 1) * chunk] = out.astype(o_ref.dtype)


def pinn_kernel_scratch(x_ref, w_in_ref, b_in_ref, w_hid_ref, b_hid_ref,
                        w_out_ref, b_out_ref, o_ref, h_ref,
                        *, n_hidden_layers, input_dim):
    """Fallback for large hidden dims: activations live in a VMEM scratch."""
    x = x_ref[...]
    w_in = w_in_ref[...]

    if input_dim <= 8:
        h = w_in[:, 0:1] * x[0:1, :]
        for k in range(1, input_dim):
            h = h + w_in[:, k:k + 1] * x[k:k + 1, :]
    else:
        h = jnp.dot(w_in, x, preferred_element_type=jnp.float32)
    h_ref[...] = jnp.tanh(h + b_in_ref[...])

    for n in range(n_hidden_layers):
        z = jnp.dot(w_hid_ref[n], h_ref[...],
                    preferred_element_type=jnp.float32) + b_hid_ref[n]
        h_ref[...] = jnp.tanh(z)

    out = jnp.dot(w_out_ref[...], h_ref[...],
                  preferred_element_type=jnp.float32) + b_out_ref[...]
    o_ref[...] = out.astype(o_ref.dtype)


# ----------------------------------------------------------------------------
# Wrapper
# ----------------------------------------------------------------------------

def _round_up(a, b):
    return ((a + b - 1) // b) * b


def _physical_vmem_bytes():
    """Per-core physical VMEM (conservative fallback = 64 MiB, v7x)."""
    try:
        info = pltpu.get_tpu_info()
        for attr in ("vmem_capacity_bytes", "vmem_size_bytes", "vmem_bytes"):
            v = getattr(info, attr, None)
            if v:
                return int(v)
    except Exception:
        pass
    return 64 << 20


def _num_tensorcores_per_device():
    try:
        return max(1, int(getattr(jax.devices()[0], "num_cores", 1)))
    except Exception:
        return 1


def pinn_forward(x, params, *, n_hidden_layers, batch_tile=None):
    """x: (N, input_dim) float32. Returns (N, output_dim)."""
    w_in, b_in, w_hid, b_hid, w_out, b_out = params
    N, input_dim = x.shape
    hidden = w_in.shape[0]
    output_dim = w_out.shape[0]

    n_tc = _num_tensorcores_per_device()
    phys_vmem = _physical_vmem_bytes()

    # ---- Tile selection: fat tiles (step overhead dominated kernel). -------
    n_pad128 = _round_up(max(N, 1), 128)
    bt = 4096 if batch_tile is None else batch_tile
    bt = max(128, min((bt // 128) * 128, n_pad128))

    # On 2-TC parts ("parallel" grid axis is sharded across cores) keep the
    # number of grid steps even for balanced work.
    if n_tc >= 2 and n_pad128 >= 256:
        g = -(-n_pad128 // bt)
        if g % 2:
            g += 1
            bt = max(128, _round_up(-(-n_pad128 // g), 128))

    use_scratch = hidden > 128

    weight_bytes = 4 * (hidden * input_dim + hidden
                        + n_hidden_layers * hidden * hidden
                        + n_hidden_layers * hidden
                        + output_dim * hidden + output_dim)

    def vmem_budget(bt_, single_buffer=True):
        io = 4 * 2 * bt_ * (input_dim + output_dim)      # double-buffered I/O
        scratch = 4 * hidden * bt_ if use_scratch else 0
        wmult = 1 if single_buffer else 2
        return wmult * weight_bytes + io + scratch

    # Generation-aware VMEM budget: shrink tile until it fits comfortably.
    while vmem_budget(bt) > int(0.8 * phys_vmem) and bt > 128:
        bt = max(128, ((bt // 2) // 128) * 128)

    n_padded = _round_up(n_pad128, bt)
    grid = (n_padded // bt,)

    # Sub-chunk size for the register-resident path (~<=32 vregs of acts).
    if not use_scratch:
        chunk = max(128, min(bt, ((32 * 1024) // max(hidden, 1)) // 128 * 128))
        while bt % chunk:
            chunk -= 128

    vmem_limit = int(min(phys_vmem,
                         max(32 << 20, 2 * vmem_budget(bt, single_buffer=False))))

    # ---- Wrapper-side layout: fused pad + transpose. ------------------------
    pad = n_padded - N
    x_t = (jnp.pad(x, ((0, pad), (0, 0))) if pad else x).T   # (input_dim, n_padded)

    flops = 2 * n_padded * (input_dim * hidden
                            + n_hidden_layers * hidden * hidden
                            + hidden * output_dim)
    transcendentals = n_padded * hidden * (n_hidden_layers + 1)
    bytes_accessed = 4 * (input_dim * n_padded + output_dim * n_padded
                          + w_in.size + b_in.size + w_hid.size + b_hid.size
                          + w_out.size + b_out.size)
    cost = pl.CostEstimate(flops=flops, transcendentals=transcendentals,
                           bytes_accessed=bytes_accessed)

    if use_scratch:
        kernel = functools.partial(pinn_kernel_scratch,
                                   n_hidden_layers=n_hidden_layers,
                                   input_dim=input_dim)
        scratch_shapes = [pltpu.VMEM((hidden, bt), jnp.float32)]
    else:
        kernel = functools.partial(pinn_kernel_reg,
                                   n_hidden_layers=n_hidden_layers,
                                   input_dim=input_dim,
                                   chunk=chunk)
        scratch_shapes = []

    def _run(single_buffer):
        def wspec(shape):
            idx = (lambda i: (0, 0)) if len(shape) == 2 else (lambda i: (0, 0, 0))
            if single_buffer:
                return pl.BlockSpec(shape, idx, pipeline_mode=pl.Buffered(1))
            return pl.BlockSpec(shape, idx)

        in_specs = [
            pl.BlockSpec((input_dim, bt), lambda i: (0, i)),           # x^T
            wspec((hidden, input_dim)),                                # w_in
            wspec((hidden, 1)),                                        # b_in
            wspec((n_hidden_layers, hidden, hidden)),                  # w_hid
            wspec((n_hidden_layers, hidden, 1)),                       # b_hid
            wspec((output_dim, hidden)),                               # w_out
            wspec((output_dim, 1)),                                    # b_out
        ]
        return pl.pallas_call(
            kernel,
            out_shape=jax.ShapeDtypeStruct((output_dim, n_padded), x.dtype),
            grid_spec=pltpu.PrefetchScalarGridSpec(
                num_scalar_prefetch=0,
                grid=grid,
                in_specs=in_specs,
                out_specs=pl.BlockSpec((output_dim, bt), lambda i: (0, i)),
                scratch_shapes=scratch_shapes,
            ),
            compiler_params=pltpu.CompilerParams(
                dimension_semantics=("parallel",),
                vmem_limit_bytes=vmem_limit),
            cost_estimate=cost,
        )(x_t, w_in, b_in, w_hid, b_hid, w_out, b_out)

    # Grid-invariant weights are single-buffered; fall back to default
    # double-buffering if this jax version rejects pipeline_mode=Buffered(1).
    try:
        out_t = _run(single_buffer=True)
    except Exception:
        out_t = _run(single_buffer=False)

    # Output: (output_dim, n_padded). Avoid an extra transpose when possible.
    if output_dim == 1:
        return out_t[0, :N][:, None]
    return out_t[:, :N].T


# ----------------------------------------------------------------------------
# Params + pure-JAX reference
# ----------------------------------------------------------------------------

def init_params(key, input_dim, hidden, output_dim, n_hidden_layers):
    """Torch-layout params: weights (out, in), biases (out, 1)."""
    ks = jax.random.split(key, 6)
    lim_in = 1.0 / input_dim ** 0.5
    w_in = jax.random.uniform(ks[0], (hidden, input_dim), jnp.float32,
                              -lim_in, lim_in)
    b_in = jax.random.uniform(ks[1], (hidden, 1), jnp.float32, -lim_in, lim_in)
    # hidden weights: xavier normal, std = sqrt(2/(fan_in+fan_out))
    xav_std = (2.0 / (hidden + hidden)) ** 0.5
    w_hid = xav_std * jax.random.normal(
        ks[2], (n_hidden_layers, hidden, hidden), jnp.float32)
    lim_h = 1.0 / hidden ** 0.5
    b_hid = jax.random.uniform(ks[3], (n_hidden_layers, hidden, 1), jnp.float32,
                               -lim_h, lim_h)
    w_out = jax.random.uniform(ks[4], (output_dim, hidden), jnp.float32,
                               -lim_h, lim_h)
    b_out = jax.random.uniform(ks[5], (output_dim, 1), jnp.float32,
                               -lim_h, lim_h)
    return w_in, b_in, w_hid, b_hid, w_out, b_out


def pinn_reference(x, params, n_hidden_layers):
    """Pure-JAX reference of the same forward pass (torch semantics)."""
    w_in, b_in, w_hid, b_hid, w_out, b_out = params
    h = jnp.tanh(x @ w_in.T + b_in[:, 0])
    for n in range(n_hidden_layers):
        h = jnp.tanh(h @ w_hid[n].T + b_hid[n][:, 0])
    return h @ w_out.T + b_out[:, 0]


if __name__ == "__main__":
    config = {
        "input_dim": 2,          # e.g. (x, t)
        "output_dim": 1,         # scalar field u(x, t)
        "n_hidden_layers": 2,
        "hidden_layer_dim": 32,
        "abs_tol": 1e-6,         # optimizer target; unused in forward
    }

    key = jax.random.PRNGKey(0)
    k_params, k_x = jax.random.split(key)

    params = init_params(k_params, config["input_dim"],
                         config["hidden_layer_dim"], config["output_dim"],
                         config["n_hidden_layers"])

    batch = 256
    x = jax.random.normal(k_x, (batch, config["input_dim"]), jnp.float32)

    out = pinn_forward(x, params, n_hidden_layers=config["n_hidden_layers"])
    out = jax.block_until_ready(out)

    ref = pinn_reference(x, params, config["n_hidden_layers"])
    assert out.shape == (batch, config["output_dim"])
    assert jnp.allclose(out, ref, atol=1e-5, rtol=1e-5)

    print("KERNEL_OK")
</pallas_src>

<mosaic_0001>
module attributes {stable_mosaic.version = 11 : i64} {
  func.func @pinn_kernel_reg(%arg0: i32, %arg1: memref<2x256xf32, #tpu.memory_space<vmem>>, %arg2: memref<32x2xf32, #tpu.memory_space<vmem>>, %arg3: memref<32x1xf32, #tpu.memory_space<vmem>>, %arg4: memref<2x32x32xf32, #tpu.memory_space<vmem>>, %arg5: memref<2x32x1xf32, #tpu.memory_space<vmem>>, %arg6: memref<1x32xf32, #tpu.memory_space<vmem>>, %arg7: memref<1x1xf32, #tpu.memory_space<vmem>>, %arg8: memref<1x256xf32, #tpu.memory_space<vmem>>) attributes {dimension_semantics = [#tpu.dimension_semantics<parallel>], iteration_bounds = array<i64: 1>, scalar_prefetch = 0 : i64, scratch_operands = 0 : i64, tpu.core_type = #tpu.core_type<tc>, window_params = [{transform_indices = @transform_0, window_bounds = array<i64: 2, 256>}, {pipeline_mode = #tpu.pipeline_mode<synchronous>, transform_indices = @transform_1, window_bounds = array<i64: 32, 2>}, {pipeline_mode = #tpu.pipeline_mode<synchronous>, transform_indices = @transform_2, window_bounds = array<i64: 32, 1>}, {pipeline_mode = #tpu.pipeline_mode<synchronous>, transform_indices = @transform_3, window_bounds = array<i64: 2, 32, 32>}, {pipeline_mode = #tpu.pipeline_mode<synchronous>, transform_indices = @transform_4, window_bounds = array<i64: 2, 32, 1>}, {pipeline_mode = #tpu.pipeline_mode<synchronous>, transform_indices = @transform_5, window_bounds = array<i64: 1, 32>}, {pipeline_mode = #tpu.pipeline_mode<synchronous>, transform_indices = @transform_6, window_bounds = array<i64: 1, 1>}, {transform_indices = @transform_7, window_bounds = array<i64: 1, 256>}]} {
    %c0 = arith.constant 0 : index
    %c0_0 = arith.constant 0 : index
    %0 = vector.load %arg2[%c0, %c0_0] : memref<32x2xf32, #tpu.memory_space<vmem>>, vector<32x2xf32>
    %c0_1 = arith.constant 0 : index
    %c0_2 = arith.constant 0 : index
    %1 = vector.load %arg3[%c0_1, %c0_2] : memref<32x1xf32, #tpu.memory_space<vmem>>, vector<32x1xf32>
    %c0_3 = arith.constant 0 : index
    %c0_4 = arith.constant 0 : index
    %2 = vector.load %arg6[%c0_3, %c0_4] : memref<1x32xf32, #tpu.memory_space<vmem>>, vector<1x32xf32>
    %c0_5 = arith.constant 0 : index
    %c0_6 = arith.constant 0 : index
    %3 = vector.load %arg7[%c0_5, %c0_6] : memref<1x1xf32, #tpu.memory_space<vmem>>, vector<1x1xf32>
    %c0_7 = arith.constant 0 : index
    %c0_8 = arith.constant 0 : index
    %4 = vector.load %arg1[%c0_7, %c0_8] : memref<2x256xf32, #tpu.memory_space<vmem>>, vector<2x256xf32>
    %5 = vector.extract_strided_slice %0 {offsets = [0, 0], sizes = [32, 1], strides = [1, 1]} : vector<32x2xf32> to vector<32x1xf32>
    %6 = vector.extract_strided_slice %4 {offsets = [0, 0], sizes = [1, 256], strides = [1, 1]} : vector<2x256xf32> to vector<1x256xf32>
    %7 = vector.broadcast %5 : vector<32x1xf32> to vector<32x256xf32>
    %8 = vector.broadcast %6 : vector<1x256xf32> to vector<32x256xf32>
    %9 = arith.mulf %7, %8 : vector<32x256xf32>
    %10 = vector.extract_strided_slice %0 {offsets = [0, 1], sizes = [32, 1], strides = [1, 1]} : vector<32x2xf32> to vector<32x1xf32>
    %11 = vector.extract_strided_slice %4 {offsets = [1, 0], sizes = [1, 256], strides = [1, 1]} : vector<2x256xf32> to vector<1x256xf32>
    %12 = vector.broadcast %10 : vector<32x1xf32> to vector<32x256xf32>
    %13 = vector.broadcast %11 : vector<1x256xf32> to vector<32x256xf32>
    %14 = arith.mulf %12, %13 : vector<32x256xf32>
    %15 = arith.addf %9, %14 : vector<32x256xf32>
    %16 = vector.broadcast %1 : vector<32x1xf32> to vector<32x256xf32>
    %17 = arith.addf %15, %16 : vector<32x256xf32>
    %18 = math.tanh %17 : vector<32x256xf32>
    %c0_9 = arith.constant 0 : index
    %c0_10 = arith.constant 0 : index
    %c0_11 = arith.constant 0 : index
    %19 = vector.load %arg4[%c0_9, %c0_10, %c0_11] : memref<2x32x32xf32, #tpu.memory_space<vmem>>, vector<1x32x32xf32>
    %20 = vector.shape_cast %19 : vector<1x32x32xf32> to vector<32x32xf32>
    %cst = arith.constant dense<0.000000e+00> : vector<32x256xf32>
    %21 = tpu.matmul %20, %18, %cst {dimension_numbers = #tpu.dot_dimension_numbers<[1], [0], [0], [1], [0, 0, 1, 1], [], []>} : vector<32x32xf32>, vector<32x256xf32>, vector<32x256xf32> -> vector<32x256xf32>
    %c0_12 = arith.constant 0 : index
    %c0_13 = arith.constant 0 : index
    %c0_14 = arith.constant 0 : index
    %22 = vector.load %arg5[%c0_12, %c0_13, %c0_14] : memref<2x32x1xf32, #tpu.memory_space<vmem>>, vector<1x32x1xf32>
    %23 = vector.shape_cast %22 : vector<1x32x1xf32> to vector<32x1xf32>
    %24 = vector.broadcast %23 : vector<32x1xf32> to vector<32x256xf32>
    %25 = arith.addf %21, %24 : vector<32x256xf32>
    %26 = math.tanh %25 : vector<32x256xf32>
    %c1 = arith.constant 1 : index
    %c0_15 = arith.constant 0 : index
    %c0_16 = arith.constant 0 : index
    %27 = vector.load %arg4[%c1, %c0_15, %c0_16] : memref<2x32x32xf32, #tpu.memory_space<vmem>>, vector<1x32x32xf32>
    %28 = vector.shape_cast %27 : vector<1x32x32xf32> to vector<32x32xf32>
    %cst_17 = arith.constant dense<0.000000e+00> : vector<32x256xf32>
    %29 = tpu.matmul %28, %26, %cst_17 {dimension_numbers = #tpu.dot_dimension_numbers<[1], [0], [0], [1], [0, 0, 1, 1], [], []>} : vector<32x32xf32>, vector<32x256xf32>, vector<32x256xf32> -> vector<32x256xf32>
    %c1_18 = arith.constant 1 : index
    %c0_19 = arith.constant 0 : index
    %c0_20 = arith.constant 0 : index
    %30 = vector.load %arg5[%c1_18, %c0_19, %c0_20] : memref<2x32x1xf32, #tpu.memory_space<vmem>>, vector<1x32x1xf32>
    %31 = vector.shape_cast %30 : vector<1x32x1xf32> to vector<32x1xf32>
    %32 = vector.broadcast %31 : vector<32x1xf32> to vector<32x256xf32>
    %33 = arith.addf %29, %32 : vector<32x256xf32>
    %34 = math.tanh %33 : vector<32x256xf32>
    %cst_21 = arith.constant dense<0.000000e+00> : vector<1x256xf32>
    %35 = tpu.matmul %2, %34, %cst_21 {dimension_numbers = #tpu.dot_dimension_numbers<[1], [0], [0], [1], [0, 0, 1, 1], [], []>} : vector<1x32xf32>, vector<32x256xf32>, vector<1x256xf32> -> vector<1x256xf32>
    %36 = vector.broadcast %3 : vector<1x1xf32> to vector<1x256xf32>
    %37 = arith.addf %35, %36 : vector<1x256xf32>
    %c0_22 = arith.constant 0 : index
    %c0_23 = arith.constant 0 : index
    %38 = vector.load %arg8[%c0_22, %c0_23] : memref<1x256xf32, #tpu.memory_space<vmem>>, vector<1x256xf32>
    tpu.vector_store %arg8[%c0_22, %c0_23], %37 {strides = array<i32>} : memref<1x256xf32, #tpu.memory_space<vmem>>, vector<1x256xf32>,
    return
  }
  func.func @transform_0(%arg0: i32) -> (i32, i32) {
    %c0_i32 = arith.constant 0 : i32
    %c0_i32_0 = arith.constant 0 : i32
    return %c0_i32, %arg0 : i32, i32
  }
  func.func @transform_1(%arg0: i32) -> (i32, i32) {
    %c0_i32 = arith.constant 0 : i32
    %c0_i32_0 = arith.constant 0 : i32
    %c0_i32_1 = arith.constant 0 : i32
    return %c0_i32, %c0_i32_0 : i32, i32
  }
  func.func @transform_2(%arg0: i32) -> (i32, i32) {
    %c0_i32 = arith.constant 0 : i32
    %c0_i32_0 = arith.constant 0 : i32
    %c0_i32_1 = arith.constant 0 : i32
    return %c0_i32, %c0_i32_0 : i32, i32
  }
  func.func @transform_3(%arg0: i32) -> (i32, i32, i32) {
    %c0_i32 = arith.constant 0 : i32
    %c0_i32_0 = arith.constant 0 : i32
    %c0_i32_1 = arith.constant 0 : i32
    %c0_i32_2 = arith.constant 0 : i32
    return %c0_i32, %c0_i32_0, %c0_i32_1 : i32, i32, i32
  }
  func.func @transform_4(%arg0: i32) -> (i32, i32, i32) {
    %c0_i32 = arith.constant 0 : i32
    %c0_i32_0 = arith.constant 0 : i32
    %c0_i32_1 = arith.constant 0 : i32
    %c0_i32_2 = arith.constant 0 : i32
    return %c0_i32, %c0_i32_0, %c0_i32_1 : i32, i32, i32
  }
  func.func @transform_5(%arg0: i32) -> (i32, i32) {
    %c0_i32 = arith.constant 0 : i32
    %c0_i32_0 = arith.constant 0 : i32
    %c0_i32_1 = arith.constant 0 : i32
    return %c0_i32, %c0_i32_0 : i32, i32
  }
  func.func @transform_6(%arg0: i32) -> (i32, i32) {
    %c0_i32 = arith.constant 0 : i32
    %c0_i32_0 = arith.constant 0 : i32
    %c0_i32_1 = arith.constant 0 : i32
    return %c0_i32, %c0_i32_0 : i32, i32
  }
  func.func @transform_7(%arg0: i32) -> (i32, i32) {
    %c0_i32 = arith.constant 0 : i32
    %c0_i32_0 = arith.constant 0 : i32
    return %c0_i32, %arg0 : i32, i32
  }
}

module attributes {stable_mosaic.version = 11 : i64} {
  func.func @pinn_kernel_reg(%arg0: i32, %arg1: memref<2x256xf32, #tpu.memory_space<vmem>>, %arg2: memref<32x2xf32, #tpu.memory_space<vmem>>, %arg3: memref<32x1xf32, #tpu.memory_space<vmem>>, %arg4: memref<2x32x32xf32, #tpu.memory_space<vmem>>, %arg5: memref<2x32x1xf32, #tpu.memory_space<vmem>>, %arg6: memref<1x32xf32, #tpu.memory_space<vmem>>, %arg7: memref<1x1xf32, #tpu.memory_space<vmem>>, %arg8: memref<1x256xf32, #tpu.memory_space<vmem>>) attributes {dimension_semantics = [#tpu.dimension_semantics<parallel>], iteration_bounds = array<i64: 1>, scalar_prefetch = 0 : i64, scratch_operands = 0 : i64, tpu.core_type = #tpu.core_type<tc>, window_params = [{transform_indices = @transform_0, window_bounds = array<i64: 2, 256>}, {pipeline_mode = #tpu.pipeline_mode<synchronous>, transform_indices = @transform_1, window_bounds = array<i64: 32, 2>}, {pipeline_mode = #tpu.pipeline_mode<synchronous>, transform_indices = @transform_2, window_bounds = array<i64: 32, 1>}, {pipeline_mode = #tpu.pipeline_mode<synchronous>, transform_indices = @transform_3, window_bounds = array<i64: 2, 32, 32>}, {pipeline_mode = #tpu.pipeline_mode<synchronous>, transform_indices = @transform_4, window_bounds = array<i64: 2, 32, 1>}, {pipeline_mode = #tpu.pipeline_mode<synchronous>, transform_indices = @transform_5, window_bounds = array<i64: 1, 32>}, {pipeline_mode = #tpu.pipeline_mode<synchronous>, transform_indices = @transform_6, window_bounds = array<i64: 1, 1>}, {transform_indices = @transform_7, window_bounds = array<i64: 1, 256>}]} {
    %c0 = arith.constant 0 : index
    %c0_0 = arith.constant 0 : index
    %0 = vector.load %arg2[%c0, %c0_0] : memref<32x2xf32, #tpu.memory_space<vmem>>, vector<32x2xf32>
    %c0_1 = arith.constant 0 : index
    %c0_2 = arith.constant 0 : index
    %1 = vector.load %arg3[%c0_1, %c0_2] : memref<32x1xf32, #tpu.memory_space<vmem>>, vector<32x1xf32>
    %c0_3 = arith.constant 0 : index
    %c0_4 = arith.constant 0 : index
    %2 = vector.load %arg6[%c0_3, %c0_4] : memref<1x32xf32, #tpu.memory_space<vmem>>, vector<1x32xf32>
    %c0_5 = arith.constant 0 : index
    %c0_6 = arith.constant 0 : index
    %3 = vector.load %arg7[%c0_5, %c0_6] : memref<1x1xf32, #tpu.memory_space<vmem>>, vector<1x1xf32>
    %c0_7 = arith.constant 0 : index
    %c0_8 = arith.constant 0 : index
    %4 = vector.load %arg1[%c0_7, %c0_8] : memref<2x256xf32, #tpu.memory_space<vmem>>, vector<2x256xf32>
    %5 = vector.extract_strided_slice %0 {offsets = [0, 0], sizes = [32, 1], strides = [1, 1]} : vector<32x2xf32> to vector<32x1xf32>
    %6 = vector.extract_strided_slice %4 {offsets = [0, 0], sizes = [1, 256], strides = [1, 1]} : vector<2x256xf32> to vector<1x256xf32>
    %7 = vector.broadcast %5 : vector<32x1xf32> to vector<32x256xf32>
    %8 = vector.broadcast %6 : vector<1x256xf32> to vector<32x256xf32>
    %9 = arith.mulf %7, %8 : vector<32x256xf32>
    %10 = vector.extract_strided_slice %0 {offsets = [0, 1], sizes = [32, 1], strides = [1, 1]} : vector<32x2xf32> to vector<32x1xf32>
    %11 = vector.extract_strided_slice %4 {offsets = [1, 0], sizes = [1, 256], strides = [1, 1]} : vector<2x256xf32> to vector<1x256xf32>
    %12 = vector.broadcast %10 : vector<32x1xf32> to vector<32x256xf32>
    %13 = vector.broadcast %11 : vector<1x256xf32> to vector<32x256xf32>
    %14 = arith.mulf %12, %13 : vector<32x256xf32>
    %15 = arith.addf %9, %14 : vector<32x256xf32>
    %16 = vector.broadcast %1 : vector<32x1xf32> to vector<32x256xf32>
    %17 = arith.addf %15, %16 : vector<32x256xf32>
    %18 = math.tanh %17 : vector<32x256xf32>
    %c0_9 = arith.constant 0 : index
    %c0_10 = arith.constant 0 : index
    %c0_11 = arith.constant 0 : index
    %19 = vector.load %arg4[%c0_9, %c0_10, %c0_11] : memref<2x32x32xf32, #tpu.memory_space<vmem>>, vector<1x32x32xf32>
    %20 = vector.shape_cast %19 : vector<1x32x32xf32> to vector<32x32xf32>
    %cst = arith.constant dense<0.000000e+00> : vector<32x256xf32>
    %21 = tpu.matmul %20, %18, %cst {dimension_numbers = #tpu.dot_dimension_numbers<[1], [0], [0], [1], [0, 0, 1, 1], [], []>} : vector<32x32xf32>, vector<32x256xf32>, vector<32x256xf32> -> vector<32x256xf32>
    %c0_12 = arith.constant 0 : index
    %c0_13 = arith.constant 0 : index
    %c0_14 = arith.constant 0 : index
    %22 = vector.load %arg5[%c0_12, %c0_13, %c0_14] : memref<2x32x1xf32, #tpu.memory_space<vmem>>, vector<1x32x1xf32>
    %23 = vector.shape_cast %22 : vector<1x32x1xf32> to vector<32x1xf32>
    %24 = vector.broadcast %23 : vector<32x1xf32> to vector<32x256xf32>
    %25 = arith.addf %21, %24 : vector<32x256xf32>
    %26 = math.tanh %25 : vector<32x256xf32>
    %c1 = arith.constant 1 : index
    %c0_15 = arith.constant 0 : index
    %c0_16 = arith.constant 0 : index
    %27 = vector.load %arg4[%c1, %c0_15, %c0_16] : memref<2x32x32xf32, #tpu.memory_space<vmem>>, vector<1x32x32xf32>
    %28 = vector.shape_cast %27 : vector<1x32x32xf32> to vector<32x32xf32>
    %cst_17 = arith.constant dense<0.000000e+00> : vector<32x256xf32>
    %29 = tpu.matmul %28, %26, %cst_17 {dimension_numbers = #tpu.dot_dimension_numbers<[1], [0], [0], [1], [0, 0, 1, 1], [], []>} : vector<32x32xf32>, vector<32x256xf32>, vector<32x256xf32> -> vector<32x256xf32>
    %c1_18 = arith.constant 1 : index
    %c0_19 = arith.constant 0 : index
    %c0_20 = arith.constant 0 : index
    %30 = vector.load %arg5[%c1_18, %c0_19, %c0_20] : memref<2x32x1xf32, #tpu.memory_space<vmem>>, vector<1x32x1xf32>
    %31 = vector.shape_cast %30 : vector<1x32x1xf32> to vector<32x1xf32>
    %32 = vector.broadcast %31 : vector<32x1xf32> to vector<32x256xf32>
    %33 = arith.addf %29, %32 : vector<32x256xf32>
    %34 = math.tanh %33 : vector<32x256xf32>
    %cst_21 = arith.constant dense<0.000000e+00> : vector<1x256xf32>
    %35 = tpu.matmul %2, %34, %cst_21 {dimension_numbers = #tpu.dot_dimension_numbers<[1], [0], [0], [1], [0, 0, 1, 1], [], []>} : vector<1x32xf32>, vector<32x256xf32>, vector<1x256xf32> -> vector<1x256xf32>
    %36 = vector.broadcast %3 : vector<1x1xf32> to vector<1x256xf32>
    %37 = arith.addf %35, %36 : vector<1x256xf32>
    %c0_22 = arith.constant 0 : index
    %c0_23 = arith.constant 0 : index
    %38 = vector.load %arg8[%c0_22, %c0_23] : memref<1x256xf32, #tpu.memory_space<vmem>>, vector<1x256xf32>
    tpu.vector_store %arg8[%c0_22, %c0_23], %37 {strides = array<i32>} : memref<1x256xf32, #tpu.memory_space<vmem>>, vector<1x256xf32>,
    return
  }
  func.func @transform_0(%arg0: i32) -> (i32, i32) {
    %c0_i32 = arith.constant 0 : i32
    %c0_i32_0 = arith.constant 0 : i32
    return %c0_i32, %arg0 : i32, i32
  }
  func.func @transform_1(%arg0: i32) -> (i32, i32) {
    %c0_i32 = arith.constant 0 : i32
    %c0_i32_0 = arith.constant 0 : i32
    %c0_i32_1 = arith.constant 0 : i32
    return %c0_i32, %c0_i32_0 : i32, i32
  }
  func.func @transform_2(%arg0: i32) -> (i32, i32) {
    %c0_i32 = arith.constant 0 : i32
    %c0_i32_0 = arith.constant 0 : i32
    %c0_i32_1 = arith.constant 0 : i32
    return %c0_i32, %c0_i32_0 : i32, i32
  }
  func.func @transform_3(%arg0: i32) -> (i32, i32, i32) {
    %c0_i32 = arith.constant 0 : i32
    %c0_i32_0 = arith.constant 0 : i32
    %c0_i32_1 = arith.constant 0 : i32
    %c0_i32_2 = arith.constant 0 : i32
    return %c0_i32, %c0_i32_0, %c0_i32_1 : i32, i32, i32
  }
  func.func @transform_4(%arg0: i32) -> (i32, i32, i32) {
    %c0_i32 = arith.constant 0 : i32
    %c0_i32_0 = arith.constant 0 : i32
    %c0_i32_1 = arith.constant 0 : i32
    %c0_i32_2 = arith.constant 0 : i32
    return %c0_i32, %c0_i32_0, %c0_i32_1 : i32, i32, i32
  }
  func.func @transform_5(%arg0: i32) -> (i32, i32) {
    %c0_i32 = arith.constant 0 : i32
    %c0_i32_0 = arith.constant 0 : i32
    %c0_i32_1 = arith.constant 0 : i32
    return %c0_i32, %c0_i32_0 : i32, i32
  }
  func.func @transform_6(%arg0: i32) -> (i32, i32) {
    %c0_i32 = arith.constant 0 : i32
    %c0_i32_0 = arith.constant 0 : i32
    %c0_i32_1 = arith.constant 0 : i32
    return %c0_i32, %c0_i32_0 : i32, i32
  }
  func.func @transform_7(%arg0: i32) -> (i32, i32) {
    %c0_i32 = arith.constant 0 : i32
    %c0_i32_0 = arith.constant 0 : i32
    return %c0_i32, %arg0 : i32, i32
  }
}

</mosaic_0001>

<bundles_post_ra>
// kernel: tpu_custom_call.1
= control target key start
LH: loop header
LB: loop body
LE: loop exit
PB: predicated region body
PF: predicated region fallthrough
CT: control target
= control target key end

     0   :  { %s865_s0 = inlined_call_operand.vmem [shape: f32[2,256], index: 0, kind: input, shape index: {}]   ;;  %s866_s1 = inlined_call_operand.vmem [shape: f32[32,2], index: 1, kind: input, shape index: {}]   ;;  %s867_s2 = inlined_call_operand.vmem [shape: f32[32,1], index: 2, kind: input, shape index: {}]   ;;  %s868_s3 = inlined_call_operand.vmem [shape: f32[2,32,32], index: 3, kind: input, shape index: {}]   ;;  %s869_s4 = inlined_call_operand.vmem [shape: f32[2,32,1], index: 4, kind: input, shape index: {}]   ;;  %s870_s5 = inlined_call_operand.vmem [shape: f32[1,32], index: 5, kind: input, shape index: {}]   ;;  %s871_s6 = inlined_call_operand.<no memory space> [shape: f32[1,1], index: 6, kind: input, shape index: {}]   ;;  %s872_s7 = inlined_call_operand.hbm [shape: f32[1,256], index: 7, kind: output, shape index: {}]  }
   0x1   :  { %v12_v0 = vstv %s871_s6 }
   0x2   :  { %13 = vst [vmem:[#allocation2] sm:$0x1] %v12_v0 }
   0x3   :  { %v31_v1 = vld [vmem:[%s866_s1 + $0x10] sm:$0xff]  ;;  %v29_v2 = vld [vmem:[%s866_s1] sm:$0xff]  ;;  %v694_v3 = vmov 1   ;;  %v30_v4 = vld [vmem:[%s866_s1 + $0x8] sm:$0xff]  ;;  %v695_v5 = vmov 0  }
   0x4   :  { %618 = vset.pattern.permute.xlu0 %v694_v3  ;;  %616 = vset.pattern.permute.xlu1 %v694_v3 }
   0x5   :  { %96 = vperm.xlu0 %618, %v31_v1   ;;  %88 = vperm.xlu1 %616, %v29_v2  }
   0x9   :  { %619 = vset.pattern.permute.xlu0 %v695_v5  ;;  %92 = vperm.xlu1 %616, %v30_v4  }
   0xa   :  { %14 = vsyncpa [#allocation4], 0  ;;  %42 = vperm.xlu0 %619, %v29_v2   ;;  %v32_v6 = vld [vmem:[%s866_s1 + $0x18] sm:$0xff]  ;;  %v34_v7 = vld [vmem:[%s867_s2 + $0x8] sm:$0xff]  ;;  %v696_v20 = vmov 0.0   ;;  %v61_v21 = vlaneseq  ;;  %vm201_vm0 = vcmask 261120  }
   0xb   :  { %v33_v8 = vld [vmem:[%s867_s2] sm:$0xff]  ;;  %v35_v10 = vld [vmem:[%s867_s2 + $0x10] sm:$0xff]  ;;  %v36_v12 = vld [vmem:[%s867_s2 + $0x18] sm:$0xff]  ;;  %278 = vmatprep.mubr.f32.mxu0 %v696_v20  ;;  %417 = vmatprep.mubr.f32.mxu1 %v696_v20  ;;  %s698_s24 = smov [#allocation3]  }
   0xc   :  { %v177_v9 = vld [vmem:[%s869_s4] sm:$0xff]  ;;  %v179_v11 = vld [vmem:[%s869_s4 + $0x10] sm:$0xff]  ;;  %v178_v14 = vld [vmem:[%s869_s4 + $0x8] sm:$0xff]  ;;  %v793_v22 = vshrl.u32 %v61_v21, 7  ;;  %s562_s25 = sshll.u32 %s698_s24, 4  ;;  %vm553_vm1 = vcmp.lt.s32.totalorder %v61_v21, 256  ;;  %s563_s25 = int_to_ptr.vmem [resolvable:$true] %s562_s25 }
   0xd   :  { %617 = vset.pattern.permute.xlu1 %v695_v5  ;;  %v578_v13 = vld [vmem:[%s869_s4 + $0x20] sm:$0xff]  ;;  %v580_v15 = vld [vmem:[%s869_s4 + $0x30] sm:$0xff]  ;;  %v180_v16 = vld [vmem:[%s869_s4 + $0x18] sm:$0xff]  ;;  %p675_p1 = scmp.lt.s32.totalorder %s563_s25, %s563_s25 }
   0xe   :  { %47 = vperm.xlu0 %619, %v30_v4   ;;  %57 = vperm.xlu1 %617, %v32_v6   ;;  %v38_v17 = vld [vmem:[#allocation2] sm:$0x1]  ;;  %v579_v18 = vld [vmem:[%s869_s4 + $0x28] sm:$0xff]  ;;  %v581_v19 = vld [vmem:[%s869_s4 + $0x38] sm:$0xff]  ;;  %v796_v25 = vsub.s32 0, %v793_v22  ;;  %v67_v26 = vsub.s32 2, %v793_v22 }
   0xf   :  { %v105_v27 = vsub.s32 1, %v793_v22  ;;  %v39_v28 = vld [vmem:[%s865_s0] sm:$0xf]  ;;  %v109_v29 = vsub.s32 3, %v793_v22 }
  0x10   :  { %v64_v31 = vrot.slane %v39_v28, %v796_v25  ;;  %v68_v33 = vrot.slane %v39_v28, %v67_v26 }
  0x11   :  { %v106_v34 = vrot.slane %v39_v28, %v105_v27  ;;  %v110_v35 = vrot.slane %v39_v28, %v109_v29 }
  0x12   :  { %52 = vperm.xlu0 %619, %v31_v1   ;;  %620 = vset.pattern.permute.xlu1 %v694_v3  ;;  %v74_v36 = vrot.slane %v64_v31, %v796_v25  ;;  %v78_v39 = vrot.slane %v68_v33, %v796_v25  ;;  %v174_v33 = vld [vmem:[%s868_s3 + $0x8] sm:$0xff] }
  0x13   :  { %100 = vperm.xlu1 %620, %v32_v6   ;;  %v116_v40 = vrot.slane %v106_v34, %v105_v27  ;;  %v120_v41 = vrot.slane %v110_v35, %v105_v27  ;;  %v175_v34 = vld [vmem:[%s868_s3 + $0x10] sm:$0xff]  ;;  %v176_v35 = vld [vmem:[%s868_s3 + $0x18] sm:$0xff] }
  0x16   :  { %144 = vperm.xlu0 %619, %v34_v7  }
  0x17   :  { %621 = vset.pattern.permute.xlu1 %v695_v5 }
  0x18   :  { %139 = vperm.xlu1 %621, %v33_v8  }
  0x1a   :  { %183 = vperm.xlu0 %619, %v177_v9  }
  0x1c   :  { %149 = vperm.xlu1 %621, %v35_v10  }
  0x1e   :  { %193 = vperm.xlu0 %619, %v179_v11  }
  0x20   :  { %154 = vperm.xlu1 %621, %v36_v12  }
  0x22   :  { %323 = vperm.xlu0 %619, %v578_v13  }
  0x24   :  { %188 = vperm.xlu1 %621, %v178_v14  }
  0x26   :  { %333 = vperm.xlu0 %619, %v580_v15  }
  0x28   :  { %198 = vperm.xlu1 %621, %v180_v16  }
  0x2a   :  { %452 = vperm.xlu0 %619, %v38_v17  }
  0x2c   :  { %328 = vperm.xlu1 %621, %v579_v18  }
  0x30   :  { %338 = vperm.xlu1 %621, %v581_v19  }
  0x84   :  { %v89_v23 = vpop.permute.xlu1 %88  ;;  %v97_v24 = vpop.permute.xlu0 %96 }
  0x85   :  { %v121_v50 = vmul.f32 %v116_v40, %v89_v23  ;;  %v122_v51 = vmul.f32 %v120_v41, %v89_v23  ;;  %v125_v62 = vmul.f32 %v116_v40, %v97_v24  ;;  %v126_v1 = vmul.f32 %v120_v41, %v97_v24 }
  0x88   :  { %v93_v30 = vpop.permute.xlu1 %92 }
  0x89   :  { %v43_v32 = vpop.permute.xlu0 %42  ;;  %v123_v46 = vmul.f32 %v116_v40, %v93_v30  ;;  %v124_v47 = vmul.f32 %v120_v41, %v93_v30 }
  0x8a   :  { %v79_v44 = vmul.f32 %v74_v36, %v43_v32  ;;  %v80_v48 = vmul.f32 %v78_v39, %v43_v32  ;;  %v173_v32 = vld [vmem:[%s868_s3] sm:$0xff] }
  0x8c   :  { %v129_v55 = vadd.f32 %v121_v50, %v79_v44  ;;  %v130_v59 = vadd.f32 %v122_v51, %v80_v48 }
  0x8d   :  { %v48_v37 = vpop.permute.xlu0 %47  ;;  %v58_v38 = vpop.permute.xlu1 %57 }
  0x8e   :  { %v81_v42 = vmul.f32 %v74_v36, %v48_v37  ;;  %v82_v43 = vmul.f32 %v78_v39, %v48_v37  ;;  %v85_v7 = vmul.f32 %v74_v36, %v58_v38  ;;  %v86_v8 = vmul.f32 %v78_v39, %v58_v38 }
  0x90   :  { %v131_v52 = vadd.f32 %v123_v46, %v81_v42  ;;  %v132_v53 = vadd.f32 %v124_v47, %v82_v43 }
  0x91   :  { %v53_v45 = vpop.permute.xlu0 %52 }
  0x92   :  { %v101_v49 = vpop.permute.xlu1 %100  ;;  %v83_v56 = vmul.f32 %v74_v36, %v53_v45  ;;  %v84_v60 = vmul.f32 %v78_v39, %v53_v45 }
  0x93   :  { %v127_v2 = vmul.f32 %v116_v40, %v101_v49  ;;  %v128_v3 = vmul.f32 %v120_v41, %v101_v49 }
  0x94   :  { %v133_v4 = vadd.f32 %v125_v62, %v83_v56  ;;  %v134_v5 = vadd.f32 %v126_v1, %v84_v60 }
  0x95   :  { %v145_v54 = vpop.permute.xlu0 %144  ;;  %v135_v11 = vadd.f32 %v127_v2, %v85_v7  ;;  %v136_v12 = vadd.f32 %v128_v3, %v86_v8  ;;  %v577_v7 = vld [vmem:[%s868_s3 + $0x38] sm:$0xff] }
  0x96   :  { %v159_v57 = vadd.f32 %v145_v54, %v131_v52  ;;  %v160_v58 = vadd.f32 %v145_v54, %v132_v53 }
  0x97   :  { %v140_v61 = vpop.permute.xlu1 %139 }
  0x98   :  { %622 = vtanh.f32 %v159_v57  ;;  %v157_v63 = vadd.f32 %v140_v61, %v129_v55  ;;  %v158_v0 = vadd.f32 %v140_v61, %v130_v59 }
  0x99   :  { %624 = vtanh.f32 %v160_v58  ;;  %v184_v36 = vpop.permute.xlu0 %183 }
  0x9a   :  { %626 = vtanh.f32 %v157_v63 }
  0x9b   :  { %628 = vtanh.f32 %v158_v0  ;;  %v150_v6 = vpop.permute.xlu1 %149 }
  0x9c   :  { %v161_v9 = vadd.f32 %v150_v6, %v133_v4  ;;  %v162_v10 = vadd.f32 %v150_v6, %v134_v5  ;;  %v574_v4 = vld [vmem:[%s868_s3 + $0x20] sm:$0xff]  ;;  %v575_v5 = vld [vmem:[%s868_s3 + $0x28] sm:$0xff]  ;;  %v576_v6 = vld [vmem:[%s868_s3 + $0x30] sm:$0xff] }
  0x9d   :  { %v194_v46 = vpop.permute.xlu0 %193 }
  0x9e   :  { %630 = vtanh.f32 %v161_v9 }
  0x9f   :  { %v155_v13 = vpop.permute.xlu1 %154  ;;  %632 = vtanh.f32 %v162_v10 }
  0xa0   :  { %v163_v14 = vadd.f32 %v155_v13, %v135_v11  ;;  %v164_v15 = vadd.f32 %v155_v13, %v136_v12 }
  0xa1   :  { %v324_v8 = vpop.permute.xlu0 %323 }
  0xa2   :  { %v623_v16 = vpop.eup %622  ;;  %634 = vtanh.f32 %v163_v14 }
  0xa3   :  { %v625_v17 = vpop.eup %624  ;;  %636 = vtanh.f32 %v164_v15  ;;  %v189_v41 = vpop.permute.xlu1 %188 }
  0xa4   :  { %v627_v18 = vpop.eup %626 }
  0xa5   :  { %v629_v19 = vpop.eup %628  ;;  %v589_v23 = vpack.c.bf16 %v623_v16, %v627_v18 }
  0xa6   :  { %v587_v24 = vpack.c.bf16 %v625_v17, %v629_v19 }
  0xa7   :  { %v199_v51 = vpop.permute.xlu1 %198 }
  0xa8   :  { %588 = vmatprep.subr.bf16.mxu0 %v587_v24  ;;  %v631_v26 = vpop.eup %630 }
  0xa9   :  { %590 = vmatpush1.bf16.msra.mxu0 %v589_v23  ;;  %v633_v27 = vpop.eup %632 }
  0xab   :  { %v329_v13 = vpop.permute.xlu1 %328 }
  0xac   :  { %v635_v28 = vpop.eup %634 }
  0xad   :  { %v637_v29 = vpop.eup %636  ;;  %v593_v30 = vpack.c.bf16 %v635_v28, %v631_v26 }
  0xae   :  { %v591_v31 = vpack.c.bf16 %v637_v29, %v633_v27 }
  0xaf   :  { %v339_v26 = vpop.permute.xlu1 %338 }
  0xb0   :  { %592 = vmatprep.subr.bf16.mxu0 %v591_v31 }
  0xb1   :  { %594 = vmatpush1.bf16.msra.mxu0 %v593_v30 }
  0xb4   :  { %570 = vmatmul.mubr.msk.f32.vlgmr.msra.gmra.mrb[0].mxu0 %vm201_vm0, %v173_v32 }
  0xb5   :  { %284 = vmatprep.mubr.f32.mxu0 %v696_v20 }
  0xb8   :  { %571 = vmatmul.mubr.msk.f32.gmra.mrb[2].mxu0 %vm201_vm0, %v174_v33 }
  0xb9   :  { %290 = vmatprep.mubr.f32.mxu0 %v696_v20 }
  0xbc   :  { %572 = vmatmul.mubr.msk.f32.gmra.mrb[4].mxu0 %vm201_vm0, %v175_v34 }
  0xbd   :  { %296 = vmatprep.mubr.f32.mxu0 %v696_v20 }
  0xc0   :  { %573 = vmatmul.mubr.msk.f32.gmra.mrb[6].mxu0 %vm201_vm0, %v176_v35 }
  0xc1   :  { %526 = vmatprep.mubr.f32.mxu0 %v696_v20 }
 0x187   :  { %v280_v37 = vpop.f32.mrb[0].mxu0 }
 0x188   :  { %v281_v38 = vadd.f32 %v280_v37, %v184_v36  ;;  %v282_v39 = vpop.f32.mrb[1].mxu0 }
 0x189   :  { %v283_v40 = vadd.f32 %v282_v39, %v184_v36 }
 0x18a   :  { %638 = vtanh.f32 %v281_v38 }
 0x18b   :  { %v286_v42 = vpop.f32.mrb[2].mxu0  ;;  %640 = vtanh.f32 %v283_v40 }
 0x18c   :  { %v287_v43 = vadd.f32 %v286_v42, %v189_v41  ;;  %v288_v44 = vpop.f32.mrb[3].mxu0 }
 0x18d   :  { %v289_v45 = vadd.f32 %v288_v44, %v189_v41  ;;  %v697_v44 = vmov 1966171168  }
 0x18e   :  { %642 = vtanh.f32 %v287_v43  ;;  %v37_v43 = vld [vmem:[%s870_s5] sm:$0x1]  ;;  %s670_s5 = scalar_lea.vmem %s563_s25, 32 }
 0x18f   :  { %644 = vtanh.f32 %v289_v45  ;;  %v292_v47 = vpop.f32.mrb[4].mxu0  ;;  %v537_v45 = vunpack.c.l.s4 %v697_v44  ;;  %p671_p0 = scmp.ne.s32.totalorder %s563_s25, %s670_s5  ;;  %p676_p2 = scmp.lt.s32.totalorder %s670_s5, %s670_s5 }
 0x190   :  { %v293_v48 = vadd.f32 %v292_v47, %v194_v46  ;;  %v294_v49 = vpop.f32.mrb[5].mxu0 }
 0x191   :  { %v295_v50 = vadd.f32 %v294_v49, %v194_v46  ;;  %v538_v47 = vunpack.c.0.s8 %v537_v45  ;;  %p677_p3 = por %p676_p2, %p675_p1 }
 0x192   :  { %646 = vtanh.f32 %v293_v48 }
 0x193   :  { %v298_v52 = vpop.f32.mrb[6].mxu0  ;;  %648 = vtanh.f32 %v295_v50  ;;  %p678_p4 = pnand %p677_p3, %p671_p0 }
 0x194   :  { %v299_v53 = vadd.f32 %v298_v52, %v199_v51  ;;  %v300_v54 = vpop.f32.mrb[7].mxu0  ;;  %v639_v56 = vpop.eup %638 }
 0x195   :  { %v301_v55 = vadd.f32 %v300_v54, %v199_v51  ;;  %v641_v57 = vpop.eup %640 }
 0x196   :  { %650 = vtanh.f32 %v299_v53  ;;  %v541_v53 = vsub.s32 %v538_v47, %v793_v22 }
 0x197   :  { %652 = vtanh.f32 %v301_v55 }
 0x198   :  { %v643_v58 = vpop.eup %642 }
 0x199   :  { %v645_v59 = vpop.eup %644  ;;  %v597_v60 = vpack.c.bf16 %v643_v58, %v639_v56 }
 0x19a   :  { %v595_v61 = vpack.c.bf16 %v645_v59, %v641_v57 }
 0x19c   :  { %596 = vmatprep.subr.bf16.mxu1 %v595_v61  ;;  %v647_v62 = vpop.eup %646 }
 0x19d   :  { %598 = vmatpush1.bf16.msra.mxu1 %v597_v60  ;;  %v649_v63 = vpop.eup %648 }
 0x1a0   :  { %v651_v0 = vpop.eup %650 }
 0x1a1   :  { %v653_v1 = vpop.eup %652  ;;  %v601_v2 = vpack.c.bf16 %v651_v0, %v647_v62 }
 0x1a2   :  { %v599_v3 = vpack.c.bf16 %v653_v1, %v649_v63 }
 0x1a4   :  { %600 = vmatprep.subr.bf16.mxu1 %v599_v3 }
 0x1a5   :  { %602 = vmatpush1.bf16.msra.mxu1 %v601_v2 }
 0x1a8   :  { %582 = vmatmul.mubr.msk.f32.vlgmr.msra.gmra.mrb[0].mxu1 %vm201_vm0, %v574_v4 }
 0x1a9   :  { %423 = vmatprep.mubr.f32.mxu1 %v696_v20 }
 0x1ac   :  { %583 = vmatmul.mubr.msk.f32.gmra.mrb[2].mxu1 %vm201_vm0, %v575_v5 }
 0x1ad   :  { %429 = vmatprep.mubr.f32.mxu1 %v696_v20 }
 0x1b0   :  { %584 = vmatmul.mubr.msk.f32.gmra.mrb[4].mxu1 %vm201_vm0, %v576_v6 }
 0x1b1   :  { %435 = vmatprep.mubr.f32.mxu1 %v696_v20  ;;  %v334_v20 = vpop.permute.xlu0 %333 }
 0x1b4   :  { %585 = vmatmul.mubr.msk.f32.gmra.mrb[6].mxu1 %vm201_vm0, %v577_v7 }
 0x1b5   :  { %v453_v46 = vpop.permute.xlu0 %452 }
 0x1b6   :  { %v458_v48 = vrot.slane %v453_v46, %v796_v25 }
 0x27b   :  { %v419_v9 = vpop.f32.mrb[0].mxu1 }
 0x27c   :  { %v420_v10 = vadd.f32 %v419_v9, %v324_v8  ;;  %v421_v11 = vpop.f32.mrb[1].mxu1 }
 0x27d   :  { %v422_v12 = vadd.f32 %v421_v11, %v324_v8 }
 0x27e   :  { %654 = vtanh.f32 %v420_v10 }
 0x27f   :  { %v425_v14 = vpop.f32.mrb[2].mxu1  ;;  %656 = vtanh.f32 %v422_v12 }
 0x280   :  { %v426_v15 = vadd.f32 %v425_v14, %v329_v13  ;;  %v427_v16 = vpop.f32.mrb[3].mxu1 }
 0x281   :  { %v428_v17 = vadd.f32 %v427_v16, %v329_v13 }
 0x282   :  { %658 = vtanh.f32 %v426_v15 }
 0x283   :  { %660 = vtanh.f32 %v428_v17  ;;  %v431_v18 = vpop.f32.mrb[4].mxu1 }
 0x284   :  { %v432_v19 = vadd.f32 %v431_v18, %v334_v20  ;;  %v433_v23 = vpop.f32.mrb[5].mxu1 }
 0x285   :  { %v434_v24 = vadd.f32 %v433_v23, %v334_v20 }
 0x286   :  { %662 = vtanh.f32 %v432_v19 }
 0x287   :  { %v437_v27 = vpop.f32.mrb[6].mxu1  ;;  %664 = vtanh.f32 %v434_v24 }
 0x288   :  { %v438_v28 = vadd.f32 %v437_v27, %v339_v26  ;;  %v439_v29 = vpop.f32.mrb[7].mxu1  ;;  %v655_v31 = vpop.eup %654 }
 0x289   :  { %v440_v30 = vadd.f32 %v439_v29, %v339_v26  ;;  %v657_v32 = vpop.eup %656 }
 0x28a   :  { %666 = vtanh.f32 %v438_v28 }
 0x28b   :  { %668 = vtanh.f32 %v440_v30 }
 0x28c   :  { %v659_v33 = vpop.eup %658 }
 0x28d   :  { %v661_v34 = vpop.eup %660  ;;  %v605_v35 = vpack.c.bf16 %v659_v33, %v655_v31 }
 0x28e   :  { %v603_v36 = vpack.c.bf16 %v661_v34, %v657_v32 }
 0x290   :  { %604 = vmatprep.subr.bf16.mxu0 %v603_v36  ;;  %v663_v37 = vpop.eup %662 }
 0x291   :  { %606 = vmatpush1.bf16.msra.mxu0 %v605_v35  ;;  %v665_v38 = vpop.eup %664 }
 0x294   :  { %v667_v39 = vpop.eup %666 }
 0x295   :  { %v669_v40 = vpop.eup %668  ;;  %v609_v41 = vpack.c.bf16 %v667_v39, %v663_v37 }
 0x296   :  { %v607_v42 = vpack.c.bf16 %v669_v40, %v665_v38 }
 0x298   :  { %608 = vmatprep.subr.bf16.mxu0 %v607_v42 }
 0x299   :  { %610 = vmatpush1.bf16.msra.mxu0 %v609_v41 }
 0x29c   :  { %586 = vmatmul.mubr.msk.f32.vlgmr.msra.gmra.mrb[8].mxu0 %vm201_vm0, %v37_v43 }
 0x36f   :  { %v528_v49 = vpop.f32.mrb[8].mxu0 }
 0x370   :  { %v529_v50 = vadd.f32 %v528_v49, %v458_v48  ;;  %v530_v51 = vpop.f32.mrb[9].mxu0 }
 0x371   :  { %v531_v52 = vadd.f32 %v530_v51, %v458_v48 }
 0x373   :  { %v535_v54 = vcombine.low %v529_v50, %v531_v52 }
 0x375   :  { %v542_v55 = vrot.slane %v535_v54, %v541_v53 }
 0x377   :  { %v549_v56 = vrot.slane %v542_v55, %v541_v53 }
 0x379   :  { %555 = vst.msk [vmem:[#allocation3] sm:$0x3] %vm553_vm1, %v549_v56 }
 0x37a   :  { %681 = shalt.err (!%p678_p4)
}
 0x37b   :  { %s682_s28 = scalar_lea.hbm %s872_s7, 32 }
 0x37c   :  { %p683_p5 = scmp.ne.s32.totalorder %s872_s7, %s682_s28  ;;  %p686_p6 = scmp.lt.u32.totalorder %s682_s28, %s872_s7 }
 0x37e   :  { %p688_p7 = pnand %p686_p6, %p683_p5 }
 0x380   :  { %691 = shalt.err (!%p688_p7)
}
 0x381   :  { %565 = dma.vmem_to_hbm [thread:$0]  %s563_s25, 32, %s872_s7, [#allocation4]  }
 0x382   :  { %692 = dma.done.wait [#allocation4], 32  }
 0x383   :  { %693 = vsyncadd [#allocation4], 4294967264 }
 0x384   :  { %569 = vsyncpa [#allocation4], 1 }

// kernel: tpu_custom_call.1
= control target key start
LH: loop header
LB: loop body
LE: loop exit
PB: predicated region body
PF: predicated region fallthrough
CT: control target
= control target key end

     0   :  { %s865_s0 = inlined_call_operand.vmem [shape: f32[2,256], index: 0, kind: input, shape index: {}]   ;;  %s866_s1 = inlined_call_operand.vmem [shape: f32[32,2], index: 1, kind: input, shape index: {}]   ;;  %s867_s2 = inlined_call_operand.vmem [shape: f32[32,1], index: 2, kind: input, shape index: {}]   ;;  %s868_s3 = inlined_call_operand.vmem [shape: f32[2,32,32], index: 3, kind: input, shape index: {}]   ;;  %s869_s4 = inlined_call_operand.vmem [shape: f32[2,32,1], index: 4, kind: input, shape index: {}]   ;;  %s870_s5 = inlined_call_operand.vmem [shape: f32[1,32], index: 5, kind: input, shape index: {}]   ;;  %s871_s6 = inlined_call_operand.<no memory space> [shape: f32[1,1], index: 6, kind: input, shape index: {}]   ;;  %s872_s7 = inlined_call_operand.hbm [shape: f32[1,256], index: 7, kind: output, shape index: {}]  }
   0x1   :  { %v12_v0 = vstv %s871_s6 }
   0x2   :  { %13 = vst [vmem:[#allocation2] sm:$0x1] %v12_v0 }
   0x3   :  { %v31_v1 = vld [vmem:[%s866_s1 + $0x10] sm:$0xff]  ;;  %v29_v2 = vld [vmem:[%s866_s1] sm:$0xff]  ;;  %v694_v3 = vmov 1   ;;  %v30_v4 = vld [vmem:[%s866_s1 + $0x8] sm:$0xff]  ;;  %v695_v5 = vmov 0  }
   0x4   :  { %618 = vset.pattern.permute.xlu0 %v694_v3  ;;  %616 = vset.pattern.permute.xlu1 %v694_v3 }
   0x5   :  { %96 = vperm.xlu0 %618, %v31_v1   ;;  %88 = vperm.xlu1 %616, %v29_v2  }
   0x9   :  { %619 = vset.pattern.permute.xlu0 %v695_v5  ;;  %92 = vperm.xlu1 %616, %v30_v4  }
   0xa   :  { %14 = vsyncpa [#allocation4], 0  ;;  %42 = vperm.xlu0 %619, %v29_v2   ;;  %v32_v6 = vld [vmem:[%s866_s1 + $0x18] sm:$0xff]  ;;  %v34_v7 = vld [vmem:[%s867_s2 + $0x8] sm:$0xff]  ;;  %v696_v20 = vmov 0.0   ;;  %v61_v21 = vlaneseq  ;;  %vm201_vm0 = vcmask 261120  }
   0xb   :  { %v33_v8 = vld [vmem:[%s867_s2] sm:$0xff]  ;;  %v35_v10 = vld [vmem:[%s867_s2 + $0x10] sm:$0xff]  ;;  %v36_v12 = vld [vmem:[%s867_s2 + $0x18] sm:$0xff]  ;;  %278 = vmatprep.mubr.f32.mxu0 %v696_v20  ;;  %417 = vmatprep.mubr.f32.mxu1 %v696_v20  ;;  %s698_s24 = smov [#allocation3]  }
   0xc   :  { %v177_v9 = vld [vmem:[%s869_s4] sm:$0xff]  ;;  %v179_v11 = vld [vmem:[%s869_s4 + $0x10] sm:$0xff]  ;;  %v178_v14 = vld [vmem:[%s869_s4 + $0x8] sm:$0xff]  ;;  %v793_v22 = vshrl.u32 %v61_v21, 7  ;;  %s562_s25 = sshll.u32 %s698_s24, 4  ;;  %vm553_vm1 = vcmp.lt.s32.totalorder %v61_v21, 256  ;;  %s563_s25 = int_to_ptr.vmem [resolvable:$true] %s562_s25 }
   0xd   :  { %617 = vset.pattern.permute.xlu1 %v695_v5  ;;  %v578_v13 = vld [vmem:[%s869_s4 + $0x20] sm:$0xff]  ;;  %v580_v15 = vld [vmem:[%s869_s4 + $0x30] sm:$0xff]  ;;  %v180_v16 = vld [vmem:[%s869_s4 + $0x18] sm:$0xff]  ;;  %p675_p1 = scmp.lt.s32.totalorder %s563_s25, %s563_s25 }
   0xe   :  { %47 = vperm.xlu0 %619, %v30_v4   ;;  %57 = vperm.xlu1 %617, %v32_v6   ;;  %v38_v17 = vld [vmem:[#allocation2] sm:$0x1]  ;;  %v579_v18 = vld [vmem:[%s869_s4 + $0x28] sm:$0xff]  ;;  %v581_v19 = vld [vmem:[%s869_s4 + $0x38] sm:$0xff]  ;;  %v796_v25 = vsub.s32 0, %v793_v22  ;;  %v67_v26 = vsub.s32 2, %v793_v22 }
   0xf   :  { %v105_v27 = vsub.s32 1, %v793_v22  ;;  %v39_v28 = vld [vmem:[%s865_s0] sm:$0xf]  ;;  %v109_v29 = vsub.s32 3, %v793_v22 }
  0x10   :  { %v64_v31 = vrot.slane %v39_v28, %v796_v25  ;;  %v68_v33 = vrot.slane %v39_v28, %v67_v26 }
  0x11   :  { %v106_v34 = vrot.slane %v39_v28, %v105_v27  ;;  %v110_v35 = vrot.slane %v39_v28, %v109_v29 }
  0x12   :  { %52 = vperm.xlu0 %619, %v31_v1   ;;  %620 = vset.pattern.permute.xlu1 %v694_v3  ;;  %v74_v36 = vrot.slane %v64_v31, %v796_v25  ;;  %v78_v39 = vrot.slane %v68_v33, %v796_v25  ;;  %v174_v33 = vld [vmem:[%s868_s3 + $0x8] sm:$0xff] }
  0x13   :  { %100 = vperm.xlu1 %620, %v32_v6   ;;  %v116_v40 = vrot.slane %v106_v34, %v105_v27  ;;  %v120_v41 = vrot.slane %v110_v35, %v105_v27  ;;  %v175_v34 = vld [vmem:[%s868_s3 + $0x10] sm:$0xff]  ;;  %v176_v35 = vld [vmem:[%s868_s3 + $0x18] sm:$0xff] }
  0x16   :  { %144 = vperm.xlu0 %619, %v34_v7  }
  0x17   :  { %621 = vset.pattern.permute.xlu1 %v695_v5 }
  0x18   :  { %139 = vperm.xlu1 %621, %v33_v8  }
  0x1a   :  { %183 = vperm.xlu0 %619, %v177_v9  }
  0x1c   :  { %149 = vperm.xlu1 %621, %v35_v10  }
  0x1e   :  { %193 = vperm.xlu0 %619, %v179_v11  }
  0x20   :  { %154 = vperm.xlu1 %621, %v36_v12  }
  0x22   :  { %323 = vperm.xlu0 %619, %v578_v13  }
  0x24   :  { %188 = vperm.xlu1 %621, %v178_v14  }
  0x26   :  { %333 = vperm.xlu0 %619, %v580_v15  }
  0x28   :  { %198 = vperm.xlu1 %621, %v180_v16  }
  0x2a   :  { %452 = vperm.xlu0 %619, %v38_v17  }
  0x2c   :  { %328 = vperm.xlu1 %621, %v579_v18  }
  0x30   :  { %338 = vperm.xlu1 %621, %v581_v19  }
  0x84   :  { %v89_v23 = vpop.permute.xlu1 %88  ;;  %v97_v24 = vpop.permute.xlu0 %96 }
  0x85   :  { %v121_v50 = vmul.f32 %v116_v40, %v89_v23  ;;  %v122_v51 = vmul.f32 %v120_v41, %v89_v23  ;;  %v125_v62 = vmul.f32 %v116_v40, %v97_v24  ;;  %v126_v1 = vmul.f32 %v120_v41, %v97_v24 }
  0x88   :  { %v93_v30 = vpop.permute.xlu1 %92 }
  0x89   :  { %v43_v32 = vpop.permute.xlu0 %42  ;;  %v123_v46 = vmul.f32 %v116_v40, %v93_v30  ;;  %v124_v47 = vmul.f32 %v120_v41, %v93_v30 }
  0x8a   :  { %v79_v44 = vmul.f32 %v74_v36, %v43_v32  ;;  %v80_v48 = vmul.f32 %v78_v39, %v43_v32  ;;  %v173_v32 = vld [vmem:[%s868_s3] sm:$0xff] }
  0x8c   :  { %v129_v55 = vadd.f32 %v121_v50, %v79_v44  ;;  %v130_v59 = vadd.f32 %v122_v51, %v80_v48 }
  0x8d   :  { %v48_v37 = vpop.permute.xlu0 %47  ;;  %v58_v38 = vpop.permute.xlu1 %57 }
  0x8e   :  { %v81_v42 = vmul.f32 %v74_v36, %v48_v37  ;;  %v82_v43 = vmul.f32 %v78_v39, %v48_v37  ;;  %v85_v7 = vmul.f32 %v74_v36, %v58_v38  ;;  %v86_v8 = vmul.f32 %v78_v39, %v58_v38 }
  0x90   :  { %v131_v52 = vadd.f32 %v123_v46, %v81_v42  ;;  %v132_v53 = vadd.f32 %v124_v47, %v82_v43 }
  0x91   :  { %v53_v45 = vpop.permute.xlu0 %52 }
  0x92   :  { %v101_v49 = vpop.permute.xlu1 %100  ;;  %v83_v56 = vmul.f32 %v74_v36, %v53_v45  ;;  %v84_v60 = vmul.f32 %v78_v39, %v53_v45 }
  0x93   :  { %v127_v2 = vmul.f32 %v116_v40, %v101_v49  ;;  %v128_v3 = vmul.f32 %v120_v41, %v101_v49 }
  0x94   :  { %v133_v4 = vadd.f32 %v125_v62, %v83_v56  ;;  %v134_v5 = vadd.f32 %v126_v1, %v84_v60 }
  0x95   :  { %v145_v54 = vpop.permute.xlu0 %144  ;;  %v135_v11 = vadd.f32 %v127_v2, %v85_v7  ;;  %v136_v12 = vadd.f32 %v128_v3, %v86_v8  ;;  %v577_v7 = vld [vmem:[%s868_s3 + $0x38] sm:$0xff] }
  0x96   :  { %v159_v57 = vadd.f32 %v145_v54, %v131_v52  ;;  %v160_v58 = vadd.f32 %v145_v54, %v132_v53 }
  0x97   :  { %v140_v61 = vpop.permute.xlu1 %139 }
  0x98   :  { %622 = vtanh.f32 %v159_v57  ;;  %v157_v63 = vadd.f32 %v140_v61, %v129_v55  ;;  %v158_v0 = vadd.f32 %v140_v61, %v130_v59 }
  0x99   :  { %624 = vtanh.f32 %v160_v58  ;;  %v184_v36 = vpop.permute.xlu0 %183 }
  0x9a   :  { %626 = vtanh.f32 %v157_v63 }
  0x9b   :  { %628 = vtanh.f32 %v158_v0  ;;  %v150_v6 = vpop.permute.xlu1 %149 }
  0x9c   :  { %v161_v9 = vadd.f32 %v150_v6, %v133_v4  ;;  %v162_v10 = vadd.f32 %v150_v6, %v134_v5  ;;  %v574_v4 = vld [vmem:[%s868_s3 + $0x20] sm:$0xff]  ;;  %v575_v5 = vld [vmem:[%s868_s3 + $0x28] sm:$0xff]  ;;  %v576_v6 = vld [vmem:[%s868_s3 + $0x30] sm:$0xff] }
  0x9d   :  { %v194_v46 = vpop.permute.xlu0 %193 }
  0x9e   :  { %630 = vtanh.f32 %v161_v9 }
  0x9f   :  { %v155_v13 = vpop.permute.xlu1 %154  ;;  %632 = vtanh.f32 %v162_v10 }
  0xa0   :  { %v163_v14 = vadd.f32 %v155_v13, %v135_v11  ;;  %v164_v15 = vadd.f32 %v155_v13, %v136_v12 }
  0xa1   :  { %v324_v8 = vpop.permute.xlu0 %323 }
  0xa2   :  { %v623_v16 = vpop.eup %622  ;;  %634 = vtanh.f32 %v163_v14 }
  0xa3   :  { %v625_v17 = vpop.eup %624  ;;  %636 = vtanh.f32 %v164_v15  ;;  %v189_v41 = vpop.permute.xlu1 %188 }
  0xa4   :  { %v627_v18 = vpop.eup %626 }
  0xa5   :  { %v629_v19 = vpop.eup %628  ;;  %v589_v23 = vpack.c.bf16 %v623_v16, %v627_v18 }
  0xa6   :  { %v587_v24 = vpack.c.bf16 %v625_v17, %v629_v19 }
  0xa7   :  { %v199_v51 = vpop.permute.xlu1 %198 }
  0xa8   :  { %588 = vmatprep.subr.bf16.mxu0 %v587_v24  ;;  %v631_v26 = vpop.eup %630 }
  0xa9   :  { %590 = vmatpush1.bf16.msra.mxu0 %v589_v23  ;;  %v633_v27 = vpop.eup %632 }
  0xab   :  { %v329_v13 = vpop.permute.xlu1 %328 }
  0xac   :  { %v635_v28 = vpop.eup %634 }
  0xad   :  { %v637_v29 = vpop.eup %636  ;;  %v593_v30 = vpack.c.bf16 %v635_v28, %v631_v26 }
  0xae   :  { %v591_v31 = vpack.c.bf16 %v637_v29, %v633_v27 }
  0xaf   :  { %v339_v26 = vpop.permute.xlu1 %338 }
  0xb0   :  { %592 = vmatprep.subr.bf16.mxu0 %v591_v31 }
  0xb1   :  { %594 = vmatpush1.bf16.msra.mxu0 %v593_v30 }
  0xb4   :  { %570 = vmatmul.mubr.msk.f32.vlgmr.msra.gmra.mrb[0].mxu0 %vm201_vm0, %v173_v32 }
  0xb5   :  { %284 = vmatprep.mubr.f32.mxu0 %v696_v20 }
  0xb8   :  { %571 = vmatmul.mubr.msk.f32.gmra.mrb[2].mxu0 %vm201_vm0, %v174_v33 }
  0xb9   :  { %290 = vmatprep.mubr.f32.mxu0 %v696_v20 }
  0xbc   :  { %572 = vmatmul.mubr.msk.f32.gmra.mrb[4].mxu0 %vm201_vm0, %v175_v34 }
  0xbd   :  { %296 = vmatprep.mubr.f32.mxu0 %v696_v20 }
  0xc0   :  { %573 = vmatmul.mubr.msk.f32.gmra.mrb[6].mxu0 %vm201_vm0, %v176_v35 }
  0xc1   :  { %526 = vmatprep.mubr.f32.mxu0 %v696_v20 }
 0x187   :  { %v280_v37 = vpop.f32.mrb[0].mxu0 }
 0x188   :  { %v281_v38 = vadd.f32 %v280_v37, %v184_v36  ;;  %v282_v39 = vpop.f32.mrb[1].mxu0 }
 0x189   :  { %v283_v40 = vadd.f32 %v282_v39, %v184_v36 }
 0x18a   :  { %638 = vtanh.f32 %v281_v38 }
 0x18b   :  { %v286_v42 = vpop.f32.mrb[2].mxu0  ;;  %640 = vtanh.f32 %v283_v40 }
 0x18c   :  { %v287_v43 = vadd.f32 %v286_v42, %v189_v41  ;;  %v288_v44 = vpop.f32.mrb[3].mxu0 }
 0x18d   :  { %v289_v45 = vadd.f32 %v288_v44, %v189_v41  ;;  %v697_v44 = vmov 1966171168  }
 0x18e   :  { %642 = vtanh.f32 %v287_v43  ;;  %v37_v43 = vld [vmem:[%s870_s5] sm:$0x1]  ;;  %s670_s5 = scalar_lea.vmem %s563_s25, 32 }
 0x18f   :  { %644 = vtanh.f32 %v289_v45  ;;  %v292_v47 = vpop.f32.mrb[4].mxu0  ;;  %v537_v45 = vunpack.c.l.s4 %v697_v44  ;;  %p671_p0 = scmp.ne.s32.totalorder %s563_s25, %s670_s5  ;;  %p676_p2 = scmp.lt.s32.totalorder %s670_s5, %s670_s5 }
 0x190   :  { %v293_v48 = vadd.f32 %v292_v47, %v194_v46  ;;  %v294_v49 = vpop.f32.mrb[5].mxu0 }
 0x191   :  { %v295_v50 = vadd.f32 %v294_v49, %v194_v46  ;;  %v538_v47 = vunpack.c.0.s8 %v537_v45  ;;  %p677_p3 = por %p676_p2, %p675_p1 }
 0x192   :  { %646 = vtanh.f32 %v293_v48 }
 0x193   :  { %v298_v52 = vpop.f32.mrb[6].mxu0  ;;  %648 = vtanh.f32 %v295_v50  ;;  %p678_p4 = pnand %p677_p3, %p671_p0 }
 0x194   :  { %v299_v53 = vadd.f32 %v298_v52, %v199_v51  ;;  %v300_v54 = vpop.f32.mrb[7].mxu0  ;;  %v639_v56 = vpop.eup %638 }
 0x195   :  { %v301_v55 = vadd.f32 %v300_v54, %v199_v51  ;;  %v641_v57 = vpop.eup %640 }
 0x196   :  { %650 = vtanh.f32 %v299_v53  ;;  %v541_v53 = vsub.s32 %v538_v47, %v793_v22 }
 0x197   :  { %652 = vtanh.f32 %v301_v55 }
 0x198   :  { %v643_v58 = vpop.eup %642 }
 0x199   :  { %v645_v59 = vpop.eup %644  ;;  %v597_v60 = vpack.c.bf16 %v643_v58, %v639_v56 }
 0x19a   :  { %v595_v61 = vpack.c.bf16 %v645_v59, %v641_v57 }
 0x19c   :  { %596 = vmatprep.subr.bf16.mxu1 %v595_v61  ;;  %v647_v62 = vpop.eup %646 }
 0x19d   :  { %598 = vmatpush1.bf16.msra.mxu1 %v597_v60  ;;  %v649_v63 = vpop.eup %648 }
 0x1a0   :  { %v651_v0 = vpop.eup %650 }
 0x1a1   :  { %v653_v1 = vpop.eup %652  ;;  %v601_v2 = vpack.c.bf16 %v651_v0, %v647_v62 }
 0x1a2   :  { %v599_v3 = vpack.c.bf16 %v653_v1, %v649_v63 }
 0x1a4   :  { %600 = vmatprep.subr.bf16.mxu1 %v599_v3 }
 0x1a5   :  { %602 = vmatpush1.bf16.msra.mxu1 %v601_v2 }
 0x1a8   :  { %582 = vmatmul.mubr.msk.f32.vlgmr.msra.gmra.mrb[0].mxu1 %vm201_vm0, %v574_v4 }
 0x1a9   :  { %423 = vmatprep.mubr.f32.mxu1 %v696_v20 }
 0x1ac   :  { %583 = vmatmul.mubr.msk.f32.gmra.mrb[2].mxu1 %vm201_vm0, %v575_v5 }
 0x1ad   :  { %429 = vmatprep.mubr.f32.mxu1 %v696_v20 }
 0x1b0   :  { %584 = vmatmul.mubr.msk.f32.gmra.mrb[4].mxu1 %vm201_vm0, %v576_v6 }
 0x1b1   :  { %435 = vmatprep.mubr.f32.mxu1 %v696_v20  ;;  %v334_v20 = vpop.permute.xlu0 %333 }
 0x1b4   :  { %585 = vmatmul.mubr.msk.f32.gmra.mrb[6].mxu1 %vm201_vm0, %v577_v7 }
 0x1b5   :  { %v453_v46 = vpop.permute.xlu0 %452 }
 0x1b6   :  { %v458_v48 = vrot.slane %v453_v46, %v796_v25 }
 0x27b   :  { %v419_v9 = vpop.f32.mrb[0].mxu1 }
 0x27c   :  { %v420_v10 = vadd.f32 %v419_v9, %v324_v8  ;;  %v421_v11 = vpop.f32.mrb[1].mxu1 }
 0x27d   :  { %v422_v12 = vadd.f32 %v421_v11, %v324_v8 }
 0x27e   :  { %654 = vtanh.f32 %v420_v10 }
 0x27f   :  { %v425_v14 = vpop.f32.mrb[2].mxu1  ;;  %656 = vtanh.f32 %v422_v12 }
 0x280   :  { %v426_v15 = vadd.f32 %v425_v14, %v329_v13  ;;  %v427_v16 = vpop.f32.mrb[3].mxu1 }
 0x281   :  { %v428_v17 = vadd.f32 %v427_v16, %v329_v13 }
 0x282   :  { %658 = vtanh.f32 %v426_v15 }
 0x283   :  { %660 = vtanh.f32 %v428_v17  ;;  %v431_v18 = vpop.f32.mrb[4].mxu1 }
 0x284   :  { %v432_v19 = vadd.f32 %v431_v18, %v334_v20  ;;  %v433_v23 = vpop.f32.mrb[5].mxu1 }
 0x285   :  { %v434_v24 = vadd.f32 %v433_v23, %v334_v20 }
 0x286   :  { %662 = vtanh.f32 %v432_v19 }
 0x287   :  { %v437_v27 = vpop.f32.mrb[6].mxu1  ;;  %664 = vtanh.f32 %v434_v24 }
 0x288   :  { %v438_v28 = vadd.f32 %v437_v27, %v339_v26  ;;  %v439_v29 = vpop.f32.mrb[7].mxu1  ;;  %v655_v31 = vpop.eup %654 }
 0x289   :  { %v440_v30 = vadd.f32 %v439_v29, %v339_v26  ;;  %v657_v32 = vpop.eup %656 }
 0x28a   :  { %666 = vtanh.f32 %v438_v28 }
 0x28b   :  { %668 = vtanh.f32 %v440_v30 }
 0x28c   :  { %v659_v33 = vpop.eup %658 }
 0x28d   :  { %v661_v34 = vpop.eup %660  ;;  %v605_v35 = vpack.c.bf16 %v659_v33, %v655_v31 }
 0x28e   :  { %v603_v36 = vpack.c.bf16 %v661_v34, %v657_v32 }
 0x290   :  { %604 = vmatprep.subr.bf16.mxu0 %v603_v36  ;;  %v663_v37 = vpop.eup %662 }
 0x291   :  { %606 = vmatpush1.bf16.msra.mxu0 %v605_v35  ;;  %v665_v38 = vpop.eup %664 }
 0x294   :  { %v667_v39 = vpop.eup %666 }
 0x295   :  { %v669_v40 = vpop.eup %668  ;;  %v609_v41 = vpack.c.bf16 %v667_v39, %v663_v37 }
 0x296   :  { %v607_v42 = vpack.c.bf16 %v669_v40, %v665_v38 }
 0x298   :  { %608 = vmatprep.subr.bf16.mxu0 %v607_v42 }
 0x299   :  { %610 = vmatpush1.bf16.msra.mxu0 %v609_v41 }
 0x29c   :  { %586 = vmatmul.mubr.msk.f32.vlgmr.msra.gmra.mrb[8].mxu0 %vm201_vm0, %v37_v43 }
 0x36f   :  { %v528_v49 = vpop.f32.mrb[8].mxu0 }
 0x370   :  { %v529_v50 = vadd.f32 %v528_v49, %v458_v48  ;;  %v530_v51 = vpop.f32.mrb[9].mxu0 }
 0x371   :  { %v531_v52 = vadd.f32 %v530_v51, %v458_v48 }
 0x373   :  { %v535_v54 = vcombine.low %v529_v50, %v531_v52 }
 0x375   :  { %v542_v55 = vrot.slane %v535_v54, %v541_v53 }
 0x377   :  { %v549_v56 = vrot.slane %v542_v55, %v541_v53 }
 0x379   :  { %555 = vst.msk [vmem:[#allocation3] sm:$0x3] %vm553_vm1, %v549_v56 }
 0x37a   :  { %681 = shalt.err (!%p678_p4)
}
 0x37b   :  { %s682_s28 = scalar_lea.hbm %s872_s7, 32 }
 0x37c   :  { %p683_p5 = scmp.ne.s32.totalorder %s872_s7, %s682_s28  ;;  %p686_p6 = scmp.lt.u32.totalorder %s682_s28, %s872_s7 }
 0x37e   :  { %p688_p7 = pnand %p686_p6, %p683_p5 }
 0x380   :  { %691 = shalt.err (!%p688_p7)
}
 0x381   :  { %565 = dma.vmem_to_hbm [thread:$0]  %s563_s25, 32, %s872_s7, [#allocation4]  }
 0x382   :  { %692 = dma.done.wait [#allocation4], 32  }
 0x383   :  { %693 = vsyncadd [#allocation4], 4294967264 }
 0x384   :  { %569 = vsyncpa [#allocation4], 1 }

</bundles_post_ra>
